<compile_context>
chip_gen: v7x
topology: tpu7x:2x2x1
jax: 0.10.0
libtpu: 0.0.40
codegen_flags: <defaults>
</compile_context>

<pallas_src>
import functools
import math

import jax
import jax.numpy as jnp
from jax.experimental import pallas as pl
from jax.experimental.pallas import tpu as pltpu

_INV_SQRT2 = 1.0 / math.sqrt(2.0)
_SQRT_2_OVER_PI = math.sqrt(2.0 / math.pi)
_MIB = 1024 * 1024


def _round_up(x, m):
    return ((x + m - 1) // m) * m


def _cdiv(a, b):
    return (a + b - 1) // b


def _tpu_vmem_capacity_bytes():
    """Physical VMEM per TensorCore (128 MiB v5e/v6e, 64 MiB v7x)."""
    try:
        info = pltpu.get_tpu_info()
        cap = getattr(info, "vmem_capacity_bytes", None)
        if cap:
            return int(cap)
    except Exception:
        pass
    return 64 * _MIB  # conservative fallback (v7x per-TC budget)


def _gelu_f32(h, use_erf):
    if use_erf:
        # PyTorch default F.gelu (exact erf).
        return 0.5 * h * (1.0 + jax.lax.erf(h * _INV_SQRT2))
    # tanh approximation: transcendental goes to the EUP slot (frees VALU),
    # numerics differ from erf GELU by ~1e-3.
    return 0.5 * h * (1.0 + jnp.tanh(_SQRT_2_OVER_PI * (h + 0.044715 * h * h * h)))


def _ffn_contrib(x_ref, w1_ref, b1_ref, w2_ref, use_erf):
    # x_ref:  (tm, in_p)     token tile (constant across k -> not re-DMA'd)
    # w1_ref: (in_p, tk)     column slice of W1^T
    # b1_ref: (n_k, 1, tk)   full f32 bias, resident; b1_ref[k] -> (1, tk)
    # w2_ref: (tk, out_p)    row slice of W2^T
    k = pl.program_id(1)
    h = jnp.dot(x_ref[...], w1_ref[...], preferred_element_type=jnp.float32)
    h = h + b1_ref[k]
    h = _gelu_f32(h, use_erf)
    return jnp.dot(h.astype(w2_ref.dtype), w2_ref[...],
                   preferred_element_type=jnp.float32)


def _ffn_kernel_direct(x_ref, w1_ref, b1_ref, w2_ref, b2_ref, o_ref, *, use_erf):
    """f32 output: accumulate straight into the resident output block."""
    k = pl.program_id(1)

    @pl.when(k == 0)
    def _():
        o_ref[...] = jnp.zeros_like(o_ref)

    o_ref[...] += _ffn_contrib(x_ref, w1_ref, b1_ref, w2_ref, use_erf)

    @pl.when(k == pl.num_programs(1) - 1)
    def _():
        o_ref[...] += b2_ref[...]
    # TODO(synk): training-mode dropout would apply a pltpu.prng_random_bits
    # mask here; eval-mode F.dropout is the identity, which is what we match.


def _ffn_kernel_scratch(x_ref, w1_ref, b1_ref, w2_ref, b2_ref, o_ref, acc_ref,
                        *, use_erf):
    """non-f32 output: accumulate in f32 scratch, bias+cast on the last step."""
    k = pl.program_id(1)

    @pl.when(k == 0)
    def _():
        acc_ref[...] = jnp.zeros_like(acc_ref)

    acc_ref[...] += _ffn_contrib(x_ref, w1_ref, b1_ref, w2_ref, use_erf)

    @pl.when(k == pl.num_programs(1) - 1)
    def _():
        o_ref[...] = (acc_ref[...] + b2_ref[...]).astype(o_ref.dtype)


def prepare_ffn_params(w1, b1, w2, b2):
    """One-time layout prep: PyTorch (out,in) weights -> (in,hidden)/(hidden,out)."""
    return w1.T, b1, w2.T, b2


def transformer_ffn(x, w1_t, b1, w2_t, b2, *, tm=None, tk=512,
                    matmul_dtype=jnp.bfloat16, approx_gelu=False,
                    vmem_limit_bytes=None, weight_buffers=None):
    """x: (..., in_dim); w1_t: (in_dim, hidden); w2_t: (hidden, out_dim)."""
    *lead, in_dim = x.shape
    hidden = w1_t.shape[1]
    out_dim = w2_t.shape[1]
    out_dtype = x.dtype
    M = math.prod(lead) if lead else 1

    # ---- generation-aware defaults ---------------------------------------
    vmem_cap = _tpu_vmem_capacity_bytes()
    if vmem_limit_bytes is None:
        # ~80% of physical VMEM: ~51 MiB on v7x, ~102 MiB on v5e/v6e.
        vmem_limit_bytes = min(int(vmem_cap * 0.8), 112 * _MIB)
    if tm is None:
        tm = 768 if vmem_cap >= 96 * _MIB else 512

    # ---- dtype handling: bf16 MXU inputs, f32 accumulate/bias/GELU --------
    x2d = x.reshape(M, in_dim)
    if matmul_dtype is not None:
        x2d = x2d.astype(matmul_dtype)
        w1_t = w1_t.astype(matmul_dtype)
        w2_t = w2_t.astype(matmul_dtype)
    mm_itemsize = jnp.dtype(x2d.dtype).itemsize
    sublane_mult = 8 * max(1, 4 // mm_itemsize)   # 8 (f32) / 16 (bf16) / 32 (int8)

    # ---- tile / padding derivation ----------------------------------------
    tk = _round_up(max(tk, 128), 128)
    in_p = _round_up(in_dim, 128)
    out_p = _round_up(out_dim, 128)
    hid_p = _round_up(hidden, 128)
    tk_eff = min(tk, hid_p)
    hid_p = _round_up(hid_p, tk_eff)              # whole number of k tiles
    n_k = hid_p // tk_eff

    # Balanced row tile: minimize M-padding waste, and ensure both v7x
    # TensorCores get a row tile whenever there is enough work for two.
    n_row = _cdiv(M, max(_round_up(tm, sublane_mult), sublane_mult))
    if M >= 2 * sublane_mult:
        n_row = max(n_row, 2)
    tm_eff = _round_up(_cdiv(M, n_row), sublane_mult)
    M_p = _round_up(M, tm_eff)

    # ---- zero-pad operands (exact: gelu(0)=0, zero weight rows/cols) ------
    x2d = jnp.pad(x2d, ((0, M_p - M), (0, in_p - in_dim)))
    w1p = jnp.pad(w1_t, ((0, in_p - in_dim), (0, hid_p - hidden)))
    w2p = jnp.pad(w2_t, ((0, hid_p - hidden), (0, out_p - out_dim)))
    b1p = jnp.pad(b1.astype(jnp.float32), (0, hid_p - hidden)).reshape(n_k, 1, tk_eff)
    b2p = jnp.pad(b2.astype(jnp.float32), (0, out_p - out_dim)).reshape(1, out_p)

    grid = (M_p // tm_eff, n_k)

    # ---- advisory cost estimate (weights re-streamed once per row tile) ---
    weight_stream_bytes = grid[0] * (
        w1p.size * w1p.dtype.itemsize + w2p.size * w2p.dtype.itemsize)
    bytes_accessed = (
        x2d.size * x2d.dtype.itemsize
        + weight_stream_bytes
        + b1p.size * 4
        + b2p.size * 4
        + M_p * out_p * jnp.dtype(out_dtype).itemsize
    )
    cost = pl.CostEstimate(
        flops=2 * M * (in_dim * hidden + hidden * out_dim),
        transcendentals=M * hidden,
        bytes_accessed=bytes_accessed,
    )

    def _weight_spec(shape, index_map):
        if weight_buffers is not None:
            return pl.BlockSpec(shape, index_map,
                                pipeline_mode=pl.Buffered(weight_buffers))
        return pl.BlockSpec(shape, index_map)

    in_specs = [
        pl.BlockSpec((tm_eff, in_p), lambda i, k: (i, 0)),        # x (k-resident)
        _weight_spec((in_p, tk_eff), lambda i, k: (0, k)),        # W1^T col slice
        pl.BlockSpec((n_k, 1, tk_eff), lambda i, k: (0, 0, 0)),   # b1 resident
        _weight_spec((tk_eff, out_p), lambda i, k: (k, 0)),       # W2^T row slice
        pl.BlockSpec((1, out_p), lambda i, k: (0, 0)),            # b2 resident
    ]
    out_spec = pl.BlockSpec((tm_eff, out_p), lambda i, k: (i, 0))

    if out_dtype == jnp.float32:
        kernel = functools.partial(_ffn_kernel_direct, use_erf=not approx_gelu)
        scratch_shapes = []
    else:
        kernel = functools.partial(_ffn_kernel_scratch, use_erf=not approx_gelu)
        scratch_shapes = [pltpu.VMEM((tm_eff, out_p), jnp.float32)]

    out2d = pl.pallas_call(
        kernel,
        out_shape=jax.ShapeDtypeStruct((M_p, out_p), out_dtype),
        grid_spec=pltpu.PrefetchScalarGridSpec(
            num_scalar_prefetch=0,
            grid=grid,
            in_specs=in_specs,
            out_specs=out_spec,
            scratch_shapes=scratch_shapes,
        ),
        compiler_params=pltpu.CompilerParams(
            dimension_semantics=("parallel", "arbitrary"),
            vmem_limit_bytes=int(vmem_limit_bytes),
        ),
        cost_estimate=cost,
    )(x2d, w1p, b1p, w2p, b2p)

    out2d = out2d[:M, :out_dim]
    return out2d.reshape(*lead, out_dim)


def _reference_ffn(x, w1, b1, w2, b2):
    h = jnp.einsum("...i,hi->...h", x, w1) + b1
    h = 0.5 * h * (1.0 + jax.lax.erf(h / math.sqrt(2.0)))
    return jnp.einsum("...h,oh->...o", h, w2) + b2


def _make_params(key, in_dim, dim_hidden, out_dim):
    kw1, kb1, kw2, kb2 = jax.random.split(key, 4)
    b1_bound = 1.0 / math.sqrt(in_dim)
    b2_bound = 1.0 / math.sqrt(dim_hidden)
    w1 = jax.random.uniform(kw1, (dim_hidden, in_dim), jnp.float32, -b1_bound, b1_bound)
    b1 = jax.random.uniform(kb1, (dim_hidden,), jnp.float32, -b1_bound, b1_bound)
    w2 = jax.random.uniform(kw2, (out_dim, dim_hidden), jnp.float32, -b2_bound, b2_bound)
    b2 = jax.random.uniform(kb2, (out_dim,), jnp.float32, -b2_bound, b2_bound)
    return w1, b1, w2, b2


if __name__ == "__main__":
    key = jax.random.PRNGKey(0)

    # --- small shapes consistent with the module --------------------------
    batch, seq = 2, 8
    in_dim, dim_hidden, out_dim = 32, 64, 32
    k0, k1 = jax.random.split(key)
    x = jax.random.normal(k0, (batch, seq, in_dim), dtype=jnp.float32)
    w1, b1, w2, b2 = _make_params(k1, in_dim, dim_hidden, out_dim)
    w1_t, b1_, w2_t, b2_ = prepare_ffn_params(w1, b1, w2, b2)  # transpose once
    ref = _reference_ffn(x, w1, b1, w2, b2)

    # default bf16-matmul path (f32 accumulate), direct-accumulate f32 output
    out = jax.block_until_ready(transformer_ffn(x, w1_t, b1_, w2_t, b2_))
    assert out.shape == (batch, seq, out_dim)
    assert jnp.allclose(out, ref, atol=3e-2, rtol=3e-2), "mismatch (bf16 default)"

    # exact f32 path matches PyTorch semantics tightly
    out_f32 = jax.block_until_ready(
        transformer_ffn(x, w1_t, b1_, w2_t, b2_, matmul_dtype=None))
    assert jnp.allclose(out_f32, ref, atol=1e-5, rtol=1e-5), "mismatch (f32)"

    # bf16 activations/output exercise the scratch-accumulator kernel path
    out_bf16 = jax.block_until_ready(
        transformer_ffn(x.astype(jnp.bfloat16), w1_t, b1_, w2_t, b2_))
    assert out_bf16.dtype == jnp.bfloat16
    assert jnp.allclose(out_bf16.astype(jnp.float32), ref, atol=5e-2, rtol=5e-2), \
        "mismatch (bf16 out)"

    # --- odd shapes: M/feature padding, multi-step hidden (reduction) axis,
    #     balanced/megacore row-tile derivation ----------------------------
    batch2, seq2 = 2, 75                      # M = 150 -> two balanced row tiles
    in2, hid2, out2 = 96, 384, 160            # non-128-aligned in/out, 3 k-steps
    k2, k3 = jax.random.split(jax.random.PRNGKey(0), 2)
    x2 = jax.random.normal(k2, (batch2, seq2, in2), dtype=jnp.float32)
    p = _make_params(k3, in2, hid2, out2)
    w1b_t, b1b, w2b_t, b2b = prepare_ffn_params(*p)
    ref_big = _reference_ffn(x2, *p)

    out_big = jax.block_until_ready(
        transformer_ffn(x2, w1b_t, b1b, w2b_t, b2b, tk=128))
    assert out_big.shape == (batch2, seq2, out2)
    assert jnp.allclose(out_big, ref_big, atol=5e-2, rtol=5e-2), "mismatch (bf16 big)"

    out_big_f32 = jax.block_until_ready(
        transformer_ffn(x2, w1b_t, b1b, w2b_t, b2b, tk=128, matmul_dtype=None))
    assert jnp.allclose(out_big_f32, ref_big, atol=1e-4, rtol=1e-4), "mismatch (f32 big)"

    print("KERNEL_OK")
</pallas_src>

<mosaic_0001>
module attributes {stable_mosaic.version = 11 : i64} {
  func.func @_ffn_kernel_direct(%arg0: i32, %arg1: i32, %arg2: memref<16x128xbf16, #tpu.memory_space<vmem>>, %arg3: memref<128x128xbf16, #tpu.memory_space<vmem>>, %arg4: memref<1x1x128xf32, #tpu.memory_space<vmem>>, %arg5: memref<128x128xbf16, #tpu.memory_space<vmem>>, %arg6: memref<1x128xf32, #tpu.memory_space<vmem>>, %arg7: memref<16x128xf32, #tpu.memory_space<vmem>>) attributes {dimension_semantics = [#tpu.dimension_semantics<parallel>, #tpu.dimension_semantics<arbitrary>], iteration_bounds = array<i64: 1, 1>, scalar_prefetch = 0 : i64, scratch_operands = 0 : i64, tpu.core_type = #tpu.core_type<tc>, window_params = [{transform_indices = @transform_0, window_bounds = array<i64: 16, 128>}, {transform_indices = @transform_1, window_bounds = array<i64: 128, 128>}, {pipeline_mode = #tpu.pipeline_mode<synchronous>, transform_indices = @transform_2, window_bounds = array<i64: 1, 1, 128>}, {transform_indices = @transform_3, window_bounds = array<i64: 128, 128>}, {pipeline_mode = #tpu.pipeline_mode<synchronous>, transform_indices = @transform_4, window_bounds = array<i64: 1, 128>}, {transform_indices = @transform_5, window_bounds = array<i64: 16, 128>}]} {
    %c0_i32 = arith.constant 0 : i32
    %0 = arith.cmpi eq, %arg1, %c0_i32 : i32
    %1 = arith.extui %0 : i1 to i32
    %c0_i32_0 = arith.constant 0 : i32
    %2 = arith.cmpi ne, %1, %c0_i32_0 : i32
    scf.if %2 {
      %cst_18 = arith.constant 0.000000e+00 : f32
      %28 = vector.broadcast %cst_18 : f32 to vector<16x128xf32>
      %c0_19 = arith.constant 0 : index
      %c0_20 = arith.constant 0 : index
      %29 = vector.load %arg7[%c0_19, %c0_20] : memref<16x128xf32, #tpu.memory_space<vmem>>, vector<16x128xf32>
      tpu.vector_store %arg7[%c0_19, %c0_20], %28 {strides = array<i32>} : memref<16x128xf32, #tpu.memory_space<vmem>>, vector<16x128xf32>,
    } else {
    }
    %c0 = arith.constant 0 : index
    %c0_1 = arith.constant 0 : index
    %3 = vector.load %arg7[%c0, %c0_1] : memref<16x128xf32, #tpu.memory_space<vmem>>, vector<16x128xf32>
    %c0_2 = arith.constant 0 : index
    %c0_3 = arith.constant 0 : index
    %4 = vector.load %arg2[%c0_2, %c0_3] : memref<16x128xbf16, #tpu.memory_space<vmem>>, vector<16x128xbf16>
    %c0_4 = arith.constant 0 : index
    %c0_5 = arith.constant 0 : index
    %5 = vector.load %arg3[%c0_4, %c0_5] : memref<128x128xbf16, #tpu.memory_space<vmem>>, vector<128x128xbf16>
    %cst = arith.constant dense<0.000000e+00> : vector<16x128xf32>
    %6 = tpu.matmul %4, %5, %cst {dimension_numbers = #tpu.dot_dimension_numbers<[1], [0], [0], [1], [0, 0, 1, 1], [], []>} : vector<16x128xbf16>, vector<128x128xbf16>, vector<16x128xf32> -> vector<16x128xf32>
    %7 = arith.index_cast %arg1 : i32 to index
    %c0_6 = arith.constant 0 : index
    %c0_7 = arith.constant 0 : index
    %8 = vector.load %arg4[%7, %c0_6, %c0_7] : memref<1x1x128xf32, #tpu.memory_space<vmem>>, vector<1x1x128xf32>
    %9 = vector.shape_cast %8 : vector<1x1x128xf32> to vector<1x128xf32>
    %10 = vector.broadcast %9 : vector<1x128xf32> to vector<16x128xf32>
    %11 = arith.addf %6, %10 : vector<16x128xf32>
    %cst_8 = arith.constant 5.000000e-01 : f32
    %12 = vector.broadcast %cst_8 : f32 to vector<16x128xf32>
    %13 = arith.mulf %12, %11 : vector<16x128xf32>
    %cst_9 = arith.constant 0.707106769 : f32
    %14 = vector.broadcast %cst_9 : f32 to vector<16x128xf32>
    %15 = arith.mulf %11, %14 : vector<16x128xf32>
    %16 = math.erf %15 : vector<16x128xf32>
    %cst_10 = arith.constant 1.000000e+00 : f32
    %17 = vector.broadcast %cst_10 : f32 to vector<16x128xf32>
    %18 = arith.addf %17, %16 : vector<16x128xf32>
    %19 = arith.mulf %13, %18 : vector<16x128xf32>
    %20 = arith.truncf %19 : vector<16x128xf32> to vector<16x128xbf16>
    %c0_11 = arith.constant 0 : index
    %c0_12 = arith.constant 0 : index
    %21 = vector.load %arg5[%c0_11, %c0_12] : memref<128x128xbf16, #tpu.memory_space<vmem>>, vector<128x128xbf16>
    %cst_13 = arith.constant dense<0.000000e+00> : vector<16x128xf32>
    %22 = tpu.matmul %20, %21, %cst_13 {dimension_numbers = #tpu.dot_dimension_numbers<[1], [0], [0], [1], [0, 0, 1, 1], [], []>} : vector<16x128xbf16>, vector<128x128xbf16>, vector<16x128xf32> -> vector<16x128xf32>
    %23 = arith.addf %3, %22 : vector<16x128xf32>
    %c0_14 = arith.constant 0 : index
    %c0_15 = arith.constant 0 : index
    %24 = vector.load %arg7[%c0_14, %c0_15] : memref<16x128xf32, #tpu.memory_space<vmem>>, vector<16x128xf32>
    tpu.vector_store %arg7[%c0_14, %c0_15], %23 {strides = array<i32>} : memref<16x128xf32, #tpu.memory_space<vmem>>, vector<16x128xf32>,
    %c0_i32_16 = arith.constant 0 : i32
    %25 = arith.cmpi eq, %arg1, %c0_i32_16 : i32
    %26 = arith.extui %25 : i1 to i32
    %c0_i32_17 = arith.constant 0 : i32
    %27 = arith.cmpi ne, %26, %c0_i32_17 : i32
    scf.if %27 {
      %c0_18 = arith.constant 0 : index
      %c0_19 = arith.constant 0 : index
      %28 = vector.load %arg7[%c0_18, %c0_19] : memref<16x128xf32, #tpu.memory_space<vmem>>, vector<16x128xf32>
      %c0_20 = arith.constant 0 : index
      %c0_21 = arith.constant 0 : index
      %29 = vector.load %arg6[%c0_20, %c0_21] : memref<1x128xf32, #tpu.memory_space<vmem>>, vector<1x128xf32>
      %30 = vector.broadcast %29 : vector<1x128xf32> to vector<16x128xf32>
      %31 = arith.addf %28, %30 : vector<16x128xf32>
      %c0_22 = arith.constant 0 : index
      %c0_23 = arith.constant 0 : index
      %32 = vector.load %arg7[%c0_22, %c0_23] : memref<16x128xf32, #tpu.memory_space<vmem>>, vector<16x128xf32>
      tpu.vector_store %arg7[%c0_22, %c0_23], %31 {strides = array<i32>} : memref<16x128xf32, #tpu.memory_space<vmem>>, vector<16x128xf32>,
    } else {
    }
    return
  }
  func.func @transform_0(%arg0: i32, %arg1: i32) -> (i32, i32) {
    %c0_i32 = arith.constant 0 : i32
    %c0_i32_0 = arith.constant 0 : i32
    return %arg0, %c0_i32 : i32, i32
  }
  func.func @transform_1(%arg0: i32, %arg1: i32) -> (i32, i32) {
    %c0_i32 = arith.constant 0 : i32
    %c0_i32_0 = arith.constant 0 : i32
    return %c0_i32, %arg1 : i32, i32
  }
  func.func @transform_2(%arg0: i32, %arg1: i32) -> (i32, i32, i32) {
    %c0_i32 = arith.constant 0 : i32
    %c0_i32_0 = arith.constant 0 : i32
    %c0_i32_1 = arith.constant 0 : i32
    %c0_i32_2 = arith.constant 0 : i32
    return %c0_i32, %c0_i32_0, %c0_i32_1 : i32, i32, i32
  }
  func.func @transform_3(%arg0: i32, %arg1: i32) -> (i32, i32) {
    %c0_i32 = arith.constant 0 : i32
    %c0_i32_0 = arith.constant 0 : i32
    return %arg1, %c0_i32 : i32, i32
  }
  func.func @transform_4(%arg0: i32, %arg1: i32) -> (i32, i32) {
    %c0_i32 = arith.constant 0 : i32
    %c0_i32_0 = arith.constant 0 : i32
    %c0_i32_1 = arith.constant 0 : i32
    return %c0_i32, %c0_i32_0 : i32, i32
  }
  func.func @transform_5(%arg0: i32, %arg1: i32) -> (i32, i32) {
    %c0_i32 = arith.constant 0 : i32
    %c0_i32_0 = arith.constant 0 : i32
    return %arg0, %c0_i32 : i32, i32
  }
}

</mosaic_0001>

<bundles_post_ra>
// kernel: tpu_custom_call.1
= control target key start
LH: loop header
LB: loop body
LE: loop exit
PB: predicated region body
PF: predicated region fallthrough
CT: control target
= control target key end

     0   :  { %10 = vsyncpa [#allocation3], 0  ;;  %s657_s0 = inlined_call_operand.hbm [shape: bf16[16,128], index: 0, kind: input, shape index: {}]   ;;  %s658_s1 = inlined_call_operand.hbm [shape: bf16[128,128], index: 1, kind: input, shape index: {}]   ;;  %s659_s2 = inlined_call_operand.vmem [shape: f32[1,1,128], index: 2, kind: input, shape index: {}]   ;;  %s660_s3 = inlined_call_operand.hbm [shape: bf16[128,128], index: 3, kind: input, shape index: {}]   ;;  %s661_s4 = inlined_call_operand.vmem [shape: f32[1,128], index: 4, kind: input, shape index: {}]   ;;  %s662_s5 = inlined_call_operand.hbm [shape: f32[16,128], index: 5, kind: output, shape index: {}]  }
   0x1   :  { %11 = vsyncpa [#allocation6], 0 }
   0x2   :  { %12 = vsyncpa [#allocation4], 0  ;;  %s547_s18 = smov [#allocation5]   ;;  %s548_s20 = smov [#allocation2]  }
   0x3   :  { %s30_s19 = sshll.u32 %s547_s18, 4  ;;  %s18_s21 = sshll.u32 %s548_s20, 4  ;;  %s31_s19 = int_to_ptr.vmem [resolvable:$true] %s30_s19  ;;  %s587_s21 = int_to_ptr.vmem [resolvable:$true] %s18_s21 }
   0x4   :  { %s453_s24 = scalar_lea.hbm %s658_s1, 1024 }
   0x5   :  { %p454_p0 = scmp.ne.s32.totalorder %s658_s1, %s453_s24  ;;  %p457_p1 = scmp.lt.u32.totalorder %s453_s24, %s658_s1 }
   0x7   :  { %p459_p2 = pnand %p457_p1, %p454_p0 }
   0x9   :  { %462 = shalt.err (!%p459_p2)
}
   0xa   :  { %s463_s29 = scalar_lea.vmem %s31_s19, 1024  ;;  %p468_p4 = scmp.lt.s32.totalorder %s31_s19, %s31_s19 }
   0xb   :  { %p464_p3 = scmp.ne.s32.totalorder %s31_s19, %s463_s29  ;;  %p469_p5 = scmp.lt.s32.totalorder %s463_s29, %s463_s29 }
   0xd   :  { %p470_p6 = por %p469_p5, %p468_p4 }
   0xf   :  { %p471_p7 = pnand %p470_p6, %p464_p3 }
  0x11   :  { %474 = shalt.err (!%p471_p7)
}
  0x12   :  { %s549_s30 = smov 64   ;;  %s550_s6 = smov 4  }
  0x13   :  { %36 = dma.hbm_to_vmem [thread:$0]  %s658_s1, 1024, %s31_s19, [#allocation6], %s549_s30, %s549_s30, %s550_s6  }
  0x14   :  { %s475_s11 = scalar_lea.hbm %s657_s0, 128 }
  0x15   :  { %p476_p8 = scmp.ne.s32.totalorder %s657_s0, %s475_s11  ;;  %p479_p9 = scmp.lt.u32.totalorder %s475_s11, %s657_s0 }
  0x17   :  { %p481_p10 = pnand %p479_p9, %p476_p8 }
  0x19   :  { %484 = shalt.err (!%p481_p10)
}
  0x1a   :  { %s485_s16 = scalar_lea.vmem %s587_s21, 128  ;;  %p490_p12 = scmp.lt.s32.totalorder %s587_s21, %s587_s21 }
  0x1b   :  { %p486_p11 = scmp.ne.s32.totalorder %s587_s21, %s485_s16  ;;  %p491_p13 = scmp.lt.s32.totalorder %s485_s16, %s485_s16 }
  0x1d   :  { %p492_p0 = por %p491_p13, %p490_p12 }
  0x1f   :  { %p493_p1 = pnand %p492_p0, %p486_p11 }
  0x21   :  { %496 = shalt.err (!%p493_p1)
}
  0x22   :  { %24 = dma.hbm_to_vmem [thread:$0]  %s657_s0, 128, %s587_s21, [#allocation3], %s549_s30, %s549_s30, %s550_s6  }
  0x23   :  { %s551_s18 = smov [#allocation7]   ;;  %s497_s23 = scalar_lea.hbm %s660_s3, 1024 }
  0x24   :  { %s44_s19 = sshll.u32 %s551_s18, 4  ;;  %p498_p2 = scmp.ne.s32.totalorder %s660_s3, %s497_s23  ;;  %s45_s19 = int_to_ptr.vmem [resolvable:$true] %s44_s19 }
  0x25   :  { %p501_p3 = scmp.lt.u32.totalorder %s497_s23, %s660_s3 }
  0x27   :  { %p503_p4 = pnand %p501_p3, %p498_p2 }
  0x29   :  { %506 = shalt.err (!%p503_p4)
}
  0x2a   :  { %s507_s28 = scalar_lea.vmem %s45_s19, 1024  ;;  %p512_p6 = scmp.lt.s32.totalorder %s45_s19, %s45_s19 }
  0x2b   :  { %p508_p5 = scmp.ne.s32.totalorder %s45_s19, %s507_s28  ;;  %p513_p7 = scmp.lt.s32.totalorder %s507_s28, %s507_s28 }
  0x2d   :  { %p514_p8 = por %p513_p7, %p512_p6 }
  0x2f   :  { %p515_p9 = pnand %p514_p8, %p508_p5 }
  0x31   :  { %518 = shalt.err (!%p515_p9)
}
  0x32   :  { %50 = dma.hbm_to_vmem [thread:$0]  %s660_s3, 1024, %s45_s19, [#allocation6], %s549_s30, %s549_s30, %s550_s6  }
  0x33   :  { %541 = dma.done.wait [#allocation3], 128  }
  0x34   :  { %542 = vsyncadd [#allocation3], 4294967168 }
  0x35   :  { %543 = dma.done.wait [#allocation6], 2048  }
  0x36   :  { %544 = vsyncadd [#allocation6], 4294965248  ;;  %v552_v0 = vmov 0.0   ;;  %vm553_vm0 = vmmov 0   ;;  %v432_v1 = vld [vmem:[#allocation5] sm:$0xff]   ;;  %v433_v2 = vld [vmem:[#allocation5 + $0x8] sm:$0xff]  }
  0x37   :  { %382 = vmatprep.subr.bf16.mxu0 %v552_v0  ;;  %398 = vmatprep.mubr.msk.bf16.mxu0 %vm553_vm0, %v552_v0  ;;  %v434_v3 = vld [vmem:[#allocation5 + $0x10] sm:$0xff]   ;;  %v441_v4 = vld [vmem:[#allocation7] sm:$0xff]   ;;  %v435_v5 = vld [vmem:[#allocation5 + $0x18] sm:$0xff]   ;;  %s554_s6 = smov [#allocation8]  }
  0x38   :  { %402 = vmatprep.subr.bf16.mxu1 %v552_v0  ;;  %418 = vmatprep.mubr.msk.bf16.mxu1 %vm553_vm0, %v552_v0  ;;  %v442_v6 = vld [vmem:[#allocation7 + $0x8] sm:$0xff]   ;;  %v436_v7 = vld [vmem:[#allocation5 + $0x20] sm:$0xff]   ;;  %v438_v9 = vld [vmem:[#allocation5 + $0x30] sm:$0xff]   ;;  %s332_s7 = sshll.u32 %s554_s6, 4  ;;  %s333_s7 = int_to_ptr.vmem [resolvable:$true] %s332_s7 }
  0x39   :  { %383 = vmatpush3.bf16.msra.mxu0 %v432_v1  ;;  %403 = vmatpush3.bf16.msra.mxu1 %v441_v4  ;;  %v437_v8 = vld [vmem:[#allocation5 + $0x28] sm:$0xff]   ;;  %v439_v10 = vld [vmem:[#allocation5 + $0x38] sm:$0xff]   ;;  %v443_v12 = vld [vmem:[#allocation7 + $0x10] sm:$0xff]   ;;  %s519_s8 = scalar_lea.vmem %s333_s7, 256  ;;  %p524_p11 = scmp.lt.s32.totalorder %s333_s7, %s333_s7 }
  0x3a   :  { %384 = vmatprep.subr.bf16.mxu0 %v552_v0  ;;  %404 = vmatprep.subr.bf16.mxu1 %v552_v0  ;;  %v440_v11 = vld [vmem:[#allocation2] sm:$0xff]   ;;  %v445_v14 = vld [vmem:[#allocation7 + $0x20] sm:$0xff]   ;;  %v446_v15 = vld [vmem:[#allocation7 + $0x28] sm:$0xff]   ;;  %p520_p10 = scmp.ne.s32.totalorder %s333_s7, %s519_s8  ;;  %p525_p12 = scmp.lt.s32.totalorder %s519_s8, %s519_s8 }
  0x3b   :  { %v444_v13 = vld [vmem:[#allocation7 + $0x18] sm:$0xff]   ;;  %v447_v16 = vld [vmem:[#allocation7 + $0x30] sm:$0xff]  }
  0x3c   :  { %v448_v17 = vld [vmem:[#allocation7 + $0x38] sm:$0xff]   ;;  %p526_p13 = por %p525_p12, %p524_p11 }
  0x3d   :  { %385 = vmatpush3.bf16.msra.mxu0 %v433_v2  ;;  %405 = vmatpush3.bf16.msra.mxu1 %v442_v6  ;;  %v345_v18 = vld [vmem:[%s659_s2] ss:$0 sm:$0xff] }
  0x3e   :  { %386 = vmatprep.subr.bf16.mxu0 %v552_v0  ;;  %406 = vmatprep.subr.bf16.mxu1 %v552_v0  ;;  %v363_v37 = vld [vmem:[%s661_s4] ss:$0 sm:$0xff]  ;;  %p527_p0 = pnand %p526_p13, %p520_p10 }
  0x41   :  { %387 = vmatpush3.bf16.msra.mxu0 %v434_v3  ;;  %407 = vmatpush3.bf16.msra.mxu1 %v443_v12 }
  0x42   :  { %388 = vmatprep.subr.bf16.mxu0 %v552_v0  ;;  %408 = vmatprep.subr.bf16.mxu1 %v552_v0 }
  0x45   :  { %389 = vmatpush3.bf16.msra.mxu0 %v435_v5  ;;  %409 = vmatpush3.bf16.msra.mxu1 %v444_v13 }
  0x46   :  { %390 = vmatprep.subr.bf16.mxu0 %v552_v0  ;;  %410 = vmatprep.subr.bf16.mxu1 %v552_v0 }
  0x49   :  { %391 = vmatpush3.bf16.msra.mxu0 %v436_v7  ;;  %411 = vmatpush3.bf16.msra.mxu1 %v445_v14 }
  0x4a   :  { %392 = vmatprep.subr.bf16.mxu0 %v552_v0  ;;  %412 = vmatprep.subr.bf16.mxu1 %v552_v0 }
  0x4d   :  { %393 = vmatpush3.bf16.msra.mxu0 %v437_v8  ;;  %413 = vmatpush3.bf16.msra.mxu1 %v446_v15 }
  0x4e   :  { %394 = vmatprep.subr.bf16.mxu0 %v552_v0  ;;  %414 = vmatprep.subr.bf16.mxu1 %v552_v0 }
  0x51   :  { %395 = vmatpush3.bf16.msra.mxu0 %v438_v9  ;;  %415 = vmatpush3.bf16.msra.mxu1 %v447_v16 }
  0x52   :  { %396 = vmatprep.subr.bf16.mxu0 %v552_v0  ;;  %416 = vmatprep.subr.bf16.mxu1 %v552_v0 }
  0x55   :  { %397 = vmatpush3.bf16.msra.mxu0 %v439_v10  ;;  %417 = vmatpush3.bf16.msra.mxu1 %v448_v17 }
  0x58   :  { %399 = vmatmul.mubr.bf16.vlgmr.msra.gmra.mrb[0].mxu0 %v440_v11 }
 0x12b   :  { %v184_v19 = vpop.f32.mrb[0].mxu0 }
 0x12c   :  { %v185_v20 = vadd.f32 %v345_v18, %v184_v19  ;;  %v400_v21 = vpop.f32.mrb[1].mxu0 }
 0x12d   :  { %v187_v22 = vpop.f32.mrb[2].mxu0 }
 0x12e   :  { %v193_v23 = vmul.f32 0.70710677, %v185_v20  ;;  %v188_v24 = vadd.f32 %v345_v18, %v187_v22  ;;  %v401_v25 = vpop.f32.mrb[3].mxu0  ;;  %v191_v30 = vmul.f32 0.5, %v185_v20 }
 0x130   :  { %449 = verf.f32 %v193_v23  ;;  %v194_v26 = vmul.f32 0.70710677, %v188_v24  ;;  %v192_v31 = vmul.f32 0.5, %v188_v24 }
 0x132   :  { %451 = verf.f32 %v194_v26 }
 0x13a   :  { %v450_v27 = vpop.eup %449 }
 0x13b   :  { %v197_v28 = vadd.f32 1.0, %v450_v27 }
 0x13c   :  { %v452_v29 = vpop.eup %451 }
 0x13d   :  { %v198_v32 = vadd.f32 1.0, %v452_v29  ;;  %v199_v33 = vmul.f32 %v197_v28, %v191_v30 }
 0x13f   :  { %v200_v34 = vmul.f32 %v198_v32, %v192_v31 }
 0x141   :  { %v201_v35 = vpack.c.bf16 %v200_v34, %v199_v33 }
 0x143   :  { %419 = vmatmul.mubr.bf16.vlgmr.msra.gmra.mrb[0].mxu1 %v201_v35 }
 0x216   :  { %v300_v36 = vpop.f32.mrb[0].mxu1 }
 0x217   :  { %v420_v38 = vpop.f32.mrb[1].mxu1  ;;  %v323_v41 = vadd.f32 %v363_v37, %v300_v36 }
 0x218   :  { %v303_v39 = vpop.f32.mrb[2].mxu1 }
 0x219   :  { %v421_v40 = vpop.f32.mrb[3].mxu1  ;;  %v324_v42 = vadd.f32 %v363_v37, %v303_v39  ;;  %325 = vst [vmem:[#allocation8] sm:$0xff] %v323_v41 }
 0x21b   :  { %326 = vst [vmem:[#allocation8 + $0x8] sm:$0xff] %v324_v42 }
 0x21c   :  { %530 = shalt.err (!%p527_p0)
}
 0x21d   :  { %s531_s4 = scalar_lea.hbm %s662_s5, 256 }
 0x21e   :  { %p532_p1 = scmp.ne.s32.totalorder %s662_s5, %s531_s4  ;;  %p535_p2 = scmp.lt.u32.totalorder %s531_s4, %s662_s5 }
 0x220   :  { %p537_p3 = pnand %p535_p2, %p532_p1 }
 0x222   :  { %540 = shalt.err (!%p537_p3)
}
 0x223   :  { %s555_s15 = smov 128   ;;  %s556_s16 = smov 8  }
 0x224   :  { %338 = dma.vmem_to_hbm [thread:$0]  %s333_s7, 256, %s662_s5, [#allocation4], %s555_s15, %s555_s15, %s556_s16  }
 0x225   :  { %545 = dma.done.wait [#allocation4], 256  }
 0x226   :  { %546 = vsyncadd [#allocation4], 4294967040 }
 0x227   :  { %342 = vsyncpa [#allocation3], 1 }
 0x228   :  { %343 = vsyncpa [#allocation6], 1 }
 0x229   :  { %344 = vsyncpa [#allocation4], 1 }

</bundles_post_ra>
